<compile_context>
chip_gen: v5e
topology: v5e:2x2
jax: 0.10.0
libtpu: 0.0.40
codegen_flags: <defaults>
</compile_context>

<pallas_src>
import math
import functools

import jax
import jax.numpy as jnp
from jax.experimental import pallas as pl
from jax.experimental.pallas import tpu as pltpu

_MIB = 1024 * 1024


def _round_up(x, m):
    return ((x + m - 1) // m) * m


def _cdiv(a, b):
    return (a + b - 1) // b


def _sublane_multiple(dtype):
    # f32 -> 8, bf16/f16 -> 16, int8/fp8 -> 32 sublanes per native tile.
    return {4: 8, 2: 16, 1: 32}.get(jnp.dtype(dtype).itemsize, 8)


def _vmem_capacity_bytes():
    try:
        return int(pltpu.get_tpu_info().vmem_capacity_bytes)
    except Exception:
        return 64 * _MIB  # conservative fallback (v7x per-TC VMEM)


def _pick_tile(dim, cap, align):
    """Largest layout-legal tile <= cap: full-dim block if it fits, else an
    `align`-aligned tile (boundary blocks handle the remainder)."""
    if dim <= cap:
        return dim
    return max(align, (cap // align) * align)


# --------------------------------------------------------------------------
# Kernels
# --------------------------------------------------------------------------
def _resident_kernel(add_bias):
    """Weight resident in VMEM, 1-D grid over M, single dot per block."""
    if add_bias:
        def kernel(x_ref, w_ref, b_ref, o_ref):
            acc = jnp.dot(x_ref[...], w_ref[...],
                          preferred_element_type=jnp.float32)
            o_ref[...] = (acc + b_ref[...].astype(jnp.float32)).astype(o_ref.dtype)
    else:
        def kernel(x_ref, w_ref, o_ref):
            o_ref[...] = jnp.dot(x_ref[...], w_ref[...],
                                 preferred_element_type=jnp.float32
                                 ).astype(o_ref.dtype)
    return kernel


def _tiled_kernel(add_bias, acc_in_out):
    """3-D (M, N, K) tiled matmul with f32 accumulation.
    acc_in_out=True accumulates directly into the (f32) output block."""
    def kernel(*refs):
        if add_bias:
            x_ref, w_ref, b_ref, *rest = refs
        else:
            x_ref, w_ref, *rest = refs
            b_ref = None
        if acc_in_out:
            (o_ref,) = rest
            acc_ref = o_ref
        else:
            o_ref, acc_ref = rest

        k = pl.program_id(2)

        @pl.when(k == 0)
        def _():
            acc_ref[...] = jnp.zeros_like(acc_ref)

        acc_ref[...] += jnp.dot(x_ref[...], w_ref[...],
                                preferred_element_type=jnp.float32)

        if add_bias or not acc_in_out:
            @pl.when(k == pl.num_programs(2) - 1)
            def _():
                res = acc_ref[...]
                if add_bias:
                    res = res + b_ref[...].astype(jnp.float32)
                o_ref[...] = res.astype(o_ref.dtype)
    return kernel


# --------------------------------------------------------------------------
# Wrapper
# --------------------------------------------------------------------------
@functools.partial(jax.jit, static_argnames=("force_tiled",))
def pallas_linear(x, weight, bias=None, *, force_tiled=False):
    """y = x @ weight.T + bias (torch.nn.functional.linear semantics).

    x:      (N, *, H_in)
    weight: (H_out, H_in)   -- PyTorch layout
    bias:   (H_out,) or None
    """
    out_features, in_features = weight.shape
    assert x.shape[-1] == in_features, "last dim of x must equal in_features"

    lead_shape = x.shape[:-1]
    M = int(math.prod(lead_shape)) if lead_shape else 1
    x2d = x.reshape(M, in_features)

    out_dtype = x.dtype
    itemsize = jnp.dtype(x.dtype).itemsize
    out_itemsize = jnp.dtype(out_dtype).itemsize
    sublane = _sublane_multiple(x.dtype)

    add_bias = bias is not None
    b2d = bias.reshape(1, out_features) if add_bias else None
    bias_bytes = out_features * jnp.dtype(bias.dtype).itemsize if add_bias else 0

    # Pre-transpose once: (H_out, H_in) -> (H_in, H_out).  Amortized over all
    # M blocks; keeps the MXU issue path free of per-tile XLU transposes.
    wt = weight.T

    cap = _vmem_capacity_bytes()
    work_budget = int(cap * 0.45)          # double-buffered working-set budget

    w_bytes = in_features * out_features * jnp.dtype(weight.dtype).itemsize
    per_row_bytes = 2 * (in_features * itemsize + out_features * out_itemsize)
    min_rows = min(_round_up(M, sublane), 128)

    resident_ok = (not force_tiled) and (
        2 * (w_bytes + bias_bytes) + per_row_bytes * min_rows <= work_budget)

    flops = 2 * M * in_features * out_features

    if resident_ok:
        # ----------------- weight-resident fast path ----------------------
        budget_rows = (work_budget - 2 * (w_bytes + bias_bytes)) // per_row_bytes
        row_cap = min(1024, max(sublane, (budget_rows // sublane) * sublane))
        tile_m = _pick_tile(M, row_cap, sublane)
        # megacore occupancy (v7x: 2 TensorCores over the parallel axis)
        if _cdiv(M, tile_m) < 2 and M > sublane:
            tile_m = _round_up(_cdiv(M, 2), sublane)

        grid = (_cdiv(M, tile_m),)
        in_specs = [
            pl.BlockSpec((tile_m, in_features), lambda i: (i, 0)),
            pl.BlockSpec((in_features, out_features), lambda i: (0, 0)),
        ]
        args = [x2d, wt]
        if add_bias:
            in_specs.append(pl.BlockSpec((1, out_features), lambda i: (0, 0)))
            args.append(b2d)
        o_spec = pl.BlockSpec((tile_m, out_features), lambda i: (i, 0))

        kernel = _resident_kernel(add_bias)
        scratch_shapes = []
        dim_sem = ("parallel",)
        resident_bytes = (2 * (w_bytes + bias_bytes)
                          + 2 * tile_m * (in_features * itemsize
                                          + out_features * out_itemsize))
        bytes_accessed = (M * in_features * itemsize + w_bytes + bias_bytes
                          + M * out_features * out_itemsize)
    else:
        # ----------------- general tiled (M, N, K) path -------------------
        if force_tiled:
            tile_m_cap, tile_n_cap, tile_k_cap = 128, 128, 128   # test-only
        else:
            tile_m_cap, tile_n_cap, tile_k_cap = 512, 512, 1024

        tile_m = _pick_tile(M, tile_m_cap, sublane)
        tile_n = _pick_tile(out_features, tile_n_cap, 128)
        tile_k = _pick_tile(in_features, tile_k_cap, 128)
        if _cdiv(M, tile_m) * _cdiv(out_features, tile_n) < 2 and M > sublane:
            tile_m = _round_up(_cdiv(M, 2), sublane)

        # Only K needs zero-padding (contraction correctness); M/N boundary
        # blocks are handled by the masked writeback.
        K_pad = _round_up(in_features, tile_k)
        if K_pad != in_features:
            x2d = jnp.pad(x2d, ((0, 0), (0, K_pad - in_features)))
            wt = jnp.pad(wt, ((0, K_pad - in_features), (0, 0)))

        grid = (_cdiv(M, tile_m), _cdiv(out_features, tile_n), K_pad // tile_k)
        acc_in_out = jnp.dtype(out_dtype) == jnp.float32

        in_specs = [
            pl.BlockSpec((tile_m, tile_k), lambda i, j, k: (i, k)),
            pl.BlockSpec((tile_k, tile_n), lambda i, j, k: (k, j)),
        ]
        args = [x2d, wt]
        if add_bias:
            in_specs.append(pl.BlockSpec((1, tile_n), lambda i, j, k: (0, j)))
            args.append(b2d)
        o_spec = pl.BlockSpec((tile_m, tile_n), lambda i, j, k: (i, j))

        kernel = _tiled_kernel(add_bias, acc_in_out)
        scratch_shapes = ([] if acc_in_out
                          else [pltpu.VMEM((tile_m, tile_n), jnp.float32)])
        dim_sem = ("parallel", "parallel", "arbitrary")
        resident_bytes = (2 * (tile_m * tile_k + tile_k * tile_n) * itemsize
                          + 2 * tile_m * tile_n * out_itemsize
                          + (0 if acc_in_out else tile_m * tile_n * 4)
                          + 2 * tile_n * itemsize)
        i_blocks, j_blocks = grid[0], grid[1]
        bytes_accessed = (M * K_pad * itemsize * j_blocks
                          + K_pad * out_features * itemsize * i_blocks
                          + bias_bytes * i_blocks
                          + M * out_features * out_itemsize)

    # VMEM limit: generous but below the physical capacity (v7x = 64 MiB/TC).
    vmem_limit = int(min(cap * 3 // 4, 64 * _MIB))
    vmem_limit = max(vmem_limit, min(int(cap * 0.85), int(resident_bytes * 1.5)))

    cost = pl.CostEstimate(flops=int(flops), transcendentals=0,
                           bytes_accessed=int(bytes_accessed))

    out2d = pl.pallas_call(
        kernel,
        out_shape=jax.ShapeDtypeStruct((M, out_features), out_dtype),
        grid_spec=pltpu.PrefetchScalarGridSpec(
            num_scalar_prefetch=0,
            grid=grid,
            in_specs=in_specs,
            out_specs=o_spec,
            scratch_shapes=scratch_shapes,
        ),
        compiler_params=pltpu.CompilerParams(
            dimension_semantics=dim_sem,
            vmem_limit_bytes=vmem_limit,
        ),
        cost_estimate=cost,
    )(*args)

    return out2d.reshape(*lead_shape, out_features)


def init_linear_params(key, in_features, out_features, bias=True,
                       dtype=jnp.float32):
    """Matches the PyTorch module's reset_parameters(): kaiming_uniform_
    (a=sqrt(5)) on weight and U(-1/sqrt(fan_in), 1/sqrt(fan_in)) on bias both
    reduce to U(-1/sqrt(in_features), 1/sqrt(in_features))."""
    kw, kb = jax.random.split(key)
    bound = 1.0 / math.sqrt(in_features)
    weight = jax.random.uniform(kw, (out_features, in_features),
                                minval=-bound, maxval=bound, dtype=dtype)
    b = None
    if bias:
        b = jax.random.uniform(kb, (out_features,),
                               minval=-bound, maxval=bound, dtype=dtype)
    return weight, b


if __name__ == "__main__":
    key = jax.random.PRNGKey(0)
    k1, k2, k3, k4, k5, k6, k7, k8 = jax.random.split(key, 8)

    # 1) module-like small shape (N, seq, H_in) -> weight-resident path
    N, seq, H_in, H_out = 2, 8, 32, 64
    x = jax.random.normal(k1, (N, seq, H_in), dtype=jnp.float32)
    w, b = init_linear_params(k2, H_in, H_out, bias=True)
    y = jax.block_until_ready(pallas_linear(x, w, b))
    y_ref = x @ w.T + b
    assert y.shape == (N, seq, H_out)
    assert jnp.allclose(y, y_ref, atol=1e-5, rtol=1e-5), "small resident mismatch"

    # 1b) bias=False path (dedicated no-bias kernel)
    y_nb = jax.block_until_ready(pallas_linear(x, w, None))
    assert jnp.allclose(y_nb, x @ w.T, atol=1e-5, rtol=1e-5), "no-bias mismatch"

    # 2) larger resident case: exercises M tiling + megacore split
    M2, K2, N2 = 1024, 1024, 384
    x2 = jax.random.normal(k3, (M2, K2), dtype=jnp.float32)
    w2, b2 = init_linear_params(k4, K2, N2, bias=True)
    y2 = jax.block_until_ready(pallas_linear(x2, w2, b2))
    assert jnp.allclose(y2, x2 @ w2.T + b2, atol=1e-4, rtol=1e-4), "resident mismatch"

    # 3) tiled fallback path (forced): ragged M/N, zero-padded multi-step K
    M3, K3, N3 = 200, 320, 192
    x3 = jax.random.normal(k5, (M3, K3), dtype=jnp.float32)
    w3, b3 = init_linear_params(k6, K3, N3, bias=True)
    y3 = jax.block_until_ready(pallas_linear(x3, w3, b3, force_tiled=True))
    assert jnp.allclose(y3, x3 @ w3.T + b3, atol=1e-4, rtol=1e-4), "tiled mismatch"
    y3nb = jax.block_until_ready(pallas_linear(x3, w3, None, force_tiled=True))
    assert jnp.allclose(y3nb, x3 @ w3.T, atol=1e-4, rtol=1e-4), "tiled no-bias mismatch"

    # 4) bf16 inputs through the tiled path (f32 accumulator scratch, sublane=16)
    M4, K4, N4 = 64, 256, 256
    x4 = jax.random.normal(k7, (M4, K4), dtype=jnp.float32).astype(jnp.bfloat16)
    w4, b4 = init_linear_params(k8, K4, N4, bias=True)
    w4, b4 = w4.astype(jnp.bfloat16), b4.astype(jnp.bfloat16)
    y4 = jax.block_until_ready(pallas_linear(x4, w4, b4, force_tiled=True))
    y4_ref = (x4.astype(jnp.float32) @ w4.astype(jnp.float32).T
              + b4.astype(jnp.float32))
    assert jnp.allclose(y4.astype(jnp.float32), y4_ref, atol=0.5, rtol=5e-2), \
        "bf16 tiled mismatch"

    print("KERNEL_OK")
</pallas_src>

<mosaic_0001>
module attributes {stable_mosaic.version = 11 : i64} {
  func.func @kernel(%arg0: i32, %arg1: memref<8x32xf32, #tpu.memory_space<vmem>>, %arg2: memref<32x64xf32, #tpu.memory_space<vmem>>, %arg3: memref<1x64xf32, #tpu.memory_space<vmem>>, %arg4: memref<8x64xf32, #tpu.memory_space<vmem>>) attributes {dimension_semantics = [#tpu.dimension_semantics<parallel>], iteration_bounds = array<i64: 2>, scalar_prefetch = 0 : i64, scratch_operands = 0 : i64, tpu.core_type = #tpu.core_type<tc>, window_params = [{transform_indices = @transform_0, window_bounds = array<i64: 8, 32>}, {pipeline_mode = #tpu.pipeline_mode<synchronous>, transform_indices = @transform_1, window_bounds = array<i64: 32, 64>}, {pipeline_mode = #tpu.pipeline_mode<synchronous>, transform_indices = @transform_2, window_bounds = array<i64: 1, 64>}, {transform_indices = @transform_3, window_bounds = array<i64: 8, 64>}]} {
    %c0 = arith.constant 0 : index
    %c0_0 = arith.constant 0 : index
    %0 = vector.load %arg1[%c0, %c0_0] : memref<8x32xf32, #tpu.memory_space<vmem>>, vector<8x32xf32>
    %c0_1 = arith.constant 0 : index
    %c0_2 = arith.constant 0 : index
    %1 = vector.load %arg2[%c0_1, %c0_2] : memref<32x64xf32, #tpu.memory_space<vmem>>, vector<32x64xf32>
    %cst = arith.constant dense<0.000000e+00> : vector<8x64xf32>
    %2 = tpu.matmul %0, %1, %cst {dimension_numbers = #tpu.dot_dimension_numbers<[1], [0], [0], [1], [0, 0, 1, 1], [], []>} : vector<8x32xf32>, vector<32x64xf32>, vector<8x64xf32> -> vector<8x64xf32>
    %c0_3 = arith.constant 0 : index
    %c0_4 = arith.constant 0 : index
    %3 = vector.load %arg3[%c0_3, %c0_4] : memref<1x64xf32, #tpu.memory_space<vmem>>, vector<1x64xf32>
    %4 = vector.broadcast %3 : vector<1x64xf32> to vector<8x64xf32>
    %5 = arith.addf %2, %4 : vector<8x64xf32>
    %c0_5 = arith.constant 0 : index
    %c0_6 = arith.constant 0 : index
    %6 = vector.load %arg4[%c0_5, %c0_6] : memref<8x64xf32, #tpu.memory_space<vmem>>, vector<8x64xf32>
    tpu.vector_store %arg4[%c0_5, %c0_6], %5 {strides = array<i32>} : memref<8x64xf32, #tpu.memory_space<vmem>>, vector<8x64xf32>,
    return
  }
  func.func @transform_0(%arg0: i32) -> (i32, i32) {
    %c0_i32 = arith.constant 0 : i32
    %c0_i32_0 = arith.constant 0 : i32
    return %arg0, %c0_i32 : i32, i32
  }
  func.func @transform_1(%arg0: i32) -> (i32, i32) {
    %c0_i32 = arith.constant 0 : i32
    %c0_i32_0 = arith.constant 0 : i32
    %c0_i32_1 = arith.constant 0 : i32
    return %c0_i32, %c0_i32_0 : i32, i32
  }
  func.func @transform_2(%arg0: i32) -> (i32, i32) {
    %c0_i32 = arith.constant 0 : i32
    %c0_i32_0 = arith.constant 0 : i32
    %c0_i32_1 = arith.constant 0 : i32
    return %c0_i32, %c0_i32_0 : i32, i32
  }
  func.func @transform_3(%arg0: i32) -> (i32, i32) {
    %c0_i32 = arith.constant 0 : i32
    %c0_i32_0 = arith.constant 0 : i32
    return %arg0, %c0_i32 : i32, i32
  }
}

</mosaic_0001>

<bundles_post_ra>
// kernel: pallas_linear.1
= control target key start
LH: loop header
LB: loop body
LE: loop exit
PB: predicated region body
PF: predicated region fallthrough
CT: control target
= control target key end

     0   :  { %8 = vsyncpa [#allocation3], 0  ;;  %s705_s0 = inlined_call_operand.hbm [shape: f32[16,32], index: 0, kind: input, shape index: {}]   ;;  %s706_s1 = inlined_call_operand.hbm [shape: f32[32,64], index: 1, kind: input, shape index: {}]   ;;  %s707_s2 = inlined_call_operand.vmem [shape: f32[1,64], index: 2, kind: input, shape index: {}]   ;;  %s708_s3 = inlined_call_operand.hbm [shape: f32[16,64], index: 3, kind: output, shape index: {}]  }
   0x1   :  { %10 = vsyncpa [#allocation3 + $0x1], 0 }
   0x2   :  { %11 = vsyncpa [#allocation6], 0 }
   0x3   :  { %12 = vsyncpa [#allocation4], 0 }
   0x4   :  { %14 = vsyncpa [#allocation4 + $0x1], 0  ;;  %s566_s12 = smov 0   ;;  %s568_s13 = smov 0  }
   0x5   :  { %s570_s14 = smov 0   ;;  %s572_s15 = smov 0  }
   0x6 LB: > { %s130_s18 = sshll.u32 %s706_s1, 4  ;;  %s590_s19 = sadd.s32 4294967295, %s541_s15   ;;  %s541_s15 = sphi %s572_s15, %s718_s15   ;;  %s537_s14 = sphi %s570_s14, %s717_s14   ;;  %s533_s13 = sphi %s568_s13, %s716_s13   ;;  %s529_s12 = sphi %s566_s12, %s715_s12   ;;  %s131_s18 = int_to_ptr.hbm [resolvable:$true] %s130_s18 }
   0x7   : > { %p337_p0 = scmp.ge.s32.totalorder %s541_s15, 1  ;;  %p41_p1 = scmp.eq.s32.totalorder %s590_s19, 0 }
   0x8   : > { %p119_p2 = scmp.lt.s32.totalorder %s541_s15, 3  ;;  %s543_s21 = smov [#allocation5]  }
   0x9   : > { %s132_s22 = sshll.u32 %s543_s21, 4  ;;  %s544_s23 = smov 128   ;;  %s133_s22 = int_to_ptr.vmem [resolvable:$true] %s132_s22 }
   0xa   : > { %p595_p3 = pnand %p337_p0, %p119_p2  ;;  %s545_s24 = smov 8  }
   0xb   : > { %s336_s25 = sadd.s32 4294967294, %s541_s15   ;;  %s606_s26 = sadd.s32 1, %s541_s15  }
   0xc   : > { %p359_p4 = pneg %p595_p3  ;;  %s27_s27 = sadd.s32 1, %s537_s14 }
   0xd   : > { %s24_s28 = ssub.s32 %s541_s15, %s606_s26  ;;  %p34_p7 = scmp.ne.s32.totalorder %s537_s14, %s533_s13 }
   0xe   : > { %p360_p6 = pnand %p359_p4, %p41_p1  ;;  %p25_p8 = scmp.eq.s32.totalorder %s24_s28, 0 }
   0xf   : > { %p35_p9 = scmp.eq.s32.totalorder %s541_s15, 0  ;;  %p40_p10 = scmp.ne.s32.totalorder %s533_s13, %s529_s12 }
  0x10   : > { %362 = dma.hbm_to_vmem [thread:$0]  (!%p360_p6), %s131_s18, 512, %s133_s22, [#allocation6], %s544_s23, %s544_s23, %s545_s24  }
  0x11   : > { %p106_p11 = scmp.eq.s32.totalorder %s590_s19, 1  ;;  %p622_p12 = por %p41_p1, %p40_p10 }
  0x12   : > { %s618_s29 = scalar_select %p25_p8, %s537_s14, %s27_s27  }
  0x13   : > { %p626_p13 = por %p106_p11, %p34_p7  ;;  %p112_p0 = scmp.eq.s32.totalorder %s336_s25, 1 }
  0x14   : > { %p36_p2 = por %p35_p9, %p34_p7  ;;  %s149_s5 = sand.u32 1, %s537_s14  }
  0x15   : > { %p631_p4 = por %p112_p0, %p40_p10  ;;  %p372_p6 = scmp.lt.s32.totalorder %s541_s15, 2 }
  0x16   : > { %s340_s7 = sshll.u32 %s149_s5, 3  ;;  %s341_s8 = sshll.u32 %s541_s15, 3 }
  0x17   : > { %s157_s11 = scalar_lea.hbm %s705_s0, %s341_s8  ;;  %s153_s17 = scalar_lea.vmem [#allocation2], %s340_s7 }
  0x18   : > { %s159_s16 = sshll.u32 %s157_s11, 4  ;;  %s161_s18 = sshll.u32 %s153_s17, 4  ;;  %s160_s16 = int_to_ptr.hbm [resolvable:$true] %s159_s16  ;;  %s162_s18 = int_to_ptr.vmem [resolvable:$true] %s161_s18 }
  0x19   : > { %p640_p8 = pnand %p372_p6, %p36_p2  ;;  %s150_s22 = scalar_lea.sflag [#allocation3], %s149_s5 }
  0x1a   : > { %s441_s23 = sshra.s32 %s160_s16, 4  ;;  %s448_s28 = scalar_lea.hbm %s705_s0, 16  ;;  %s442_s23 = int_to_ptr.hbm [resolvable:$true] %s441_s23 }
  0x1b   : > { %s443_s24 = scalar_lea.hbm %s442_s23, 8  ;;  %p445_p9 = pneg %p640_p8 }
  0x1c   : > { %p444_p7 = scmp.ne.s32.totalorder %s442_s23, %s443_s24  ;;  %p449_p0 = scmp.lt.s32.totalorder %s442_s23, %s705_s0 }
  0x1d   : > { %p450_p2 = scmp.lt.s32.totalorder %s448_s28, %s443_s24 }
  0x1e   : > { %p446_p10 = pnand %p445_p9, %p444_p7 }
  0x1f   : > { %p451_p6 = por %p450_p2, %p449_p0 }
  0x20   : > { %p447_p11 = pneg %p446_p10 }
  0x22   : > { %p452_p5 = pnand %p451_p6, %p447_p11 }
  0x24   : > { %455 = shalt.err (!%p452_p5)
}
  0x25   : > { %366 = dma.hbm_to_vmem [thread:$0]  (!%p640_p8), %s160_s16, 128, %s162_s18, %s150_s22  }
  0x26   : > { %170 = sbr.rel (%p595_p3) target bundleno = 185 (0xb9), region = 32  ;;  %s657_s5 = sand.u32 (!%p595_p3), 1, %s533_s13  }
  0x27   : > { %s343_s9 = sshll.u32 (!%p595_p3), %s657_s5, 3  ;;  %s173_s10 = scalar_lea.sflag (!%p595_p3), [#allocation3], %s657_s5 }
  0x28   : > { %s176_s11 = scalar_lea.vmem (!%p595_p3), [#allocation2], %s343_s9 }
  0x2b   : > { %516 = dma.done.wait (%p622_p12), %s173_s10, 128  }
  0x2c   : > { %518 = vsyncadd (%p622_p12), %s173_s10, 4294967168 }
  0x2d   : > { %520 = dma.done.wait (%p41_p1), [#allocation6], 512  }
  0x2e   : > { %522 = vsyncadd (%p41_p1), [#allocation6], 4294966784  ;;  %v209_v0 = vld [vmem:[#allocation5 + $0x18] sm:$0xff]  ;;  %v208_v1 = vld [vmem:[#allocation5 + $0x10] sm:$0xff]  ;;  %vm214_vm0 = vcmask 261120   ;;  %s348_s20 = sshll.u32 %s590_s19, 3 }
  0x2f   : > { %230 = vmatpush.msra.mxu0 %v209_v0  ;;  %v207_v2 = vld [vmem:[#allocation5 + $0x8] sm:$0xff]  ;;  %v206_v3 = vld [vmem:[#allocation5] sm:$0xff]  ;;  %v205_v4 = vld [vmem:[%s176_s11] sm:$0xff]  ;;  %s251_s17 = scalar_lea.hbm %s708_s3, %s348_s20  ;;  %s204_s22 = scalar_lea.vmem [#allocation7], %s343_s9  ;;  %vm238_vm1 = vcmask 523264  }
  0x30   : > { %v410_v5 = vld [vmem:[%s707_s2] ss:$0 sm:$0xff]  ;;  %s253_s23 = sshll.u32 %s204_s22, 4  ;;  %s255_s24 = sshll.u32 %s251_s17, 4  ;;  %s254_s23 = int_to_ptr.vmem [resolvable:$true] %s253_s23  ;;  %s256_s24 = int_to_ptr.hbm [resolvable:$true] %s255_s24 }
  0x31   : > { %231 = vmatpush.msra.mxu0 %v208_v1  ;;  %s241_s25 = scalar_lea.sflag [#allocation4], %s657_s5  ;;  %s485_s19 = sshra.s32 %s256_s24, 4  ;;  %s486_s19 = int_to_ptr.hbm [resolvable:$true] %s485_s19 }
  0x32   : > { %s487_s27 = scalar_lea.hbm %s486_s19, 8  ;;  %s491_s8 = scalar_lea.hbm %s708_s3, 16 }
  0x33   : > { %232 = vmatpush.msra.mxu0 %v207_v2  ;;  %p488_p1 = scmp.ne.s32.totalorder %s486_s19, %s487_s27  ;;  %p492_p12 = scmp.lt.s32.totalorder %s486_s19, %s708_s3 }
  0x34   : > { %p493_p8 = scmp.lt.s32.totalorder %s491_s8, %s487_s27 }
  0x35   : > { %233 = vmatpush.msra.mxu0 %v206_v3  ;;  %p489_p3 = pnand %p488_p1, %p626_p13 }
  0x36   : > { %346 = vmatmul.msk.f32.vlgmr.msra.gmra.mxu0 %vm214_vm0, %v205_v4  ;;  %p494_p7 = por %p493_p8, %p492_p12 }
  0x37   : > { %p490_p5 = pneg %p489_p3 }
  0x39   : > { %p495_p9 = pnand %p494_p7, %p490_p5 }
  0xb3   : > { %v235_v6 = vpop.f32.mrf.mxu0 }
  0xb4   : > { %v236_v7 = vadd.f32 %v410_v5, %v235_v6 }
  0xb6   : > { %239 = vst.msk [vmem:[%s204_s22] sm:$0xff] %vm238_vm1, %v236_v7 }
  0xb7   : > { %498 = shalt.err (!%p495_p9)
}
  0xb8   : > { %357 = dma.vmem_to_hbm [thread:$0]  (%p626_p13), %s254_s23, 128, %s256_s24, %s241_s25  }
  0xb9 PF: > { %s267_s5 = sand.u32 1, %s529_s12   ;;  %p714_p10 = scmp.ge.s32.totalorder %s541_s15, 2 }
  0xba   : > { %s268_s11 = scalar_lea.sflag [#allocation4], %s267_s5 }
  0xbb   : > { %p368_p11 = pnand %p714_p10, %p631_p4 }
  0xbd   : > { %p369_p0 = pneg %p368_p11 }
  0xbf   : > { %524 = dma.done.wait (%p369_p0), %s268_s11, 128  }
  0xc0   : > { %526 = vsyncadd (%p369_p0), %s268_s11, 4294967168  ;;  %p17_p2 = scmp.ge.s32.totalorder %s606_s26, 4   ;;  %s715_s12 = smov %s533_s13 }
  0xc1   : > { %s716_s13 = smov %s537_s14  ;;  %s717_s14 = smov %s618_s29 }
  0xc2   : > { %s718_s15 = smov %s606_s26  ;;  %19 = sbr.rel (!%p17_p2) target bundleno = 6 (0x6), region = 81 }
  0xc7   :  { %274 = vsyncpa [#allocation3], 1 }
  0xc8   :  { %276 = vsyncpa [#allocation3 + $0x1], 1 }
  0xc9   :  { %277 = vsyncpa [#allocation6], 1 }
  0xca   :  { %278 = vsyncpa [#allocation4], 1 }
  0xcb   :  { %280 = vsyncpa [#allocation4 + $0x1], 1 }

</bundles_post_ra>
